<compile_context>
chip_gen: v5e
topology: v5e:2x2
jax: 0.10.0
libtpu: 0.0.40
codegen_flags: <defaults>
</compile_context>

<pallas_src>
import jax
import jax.numpy as jnp
from jax.experimental import pallas as pl
from jax.experimental.pallas import tpu as pltpu


def multiply_c_kernel(ref_ref, wt_ref, x_ref, o_ref):
    # ref_ref: [TB, IN], wt_ref: [IN, HID] (pre-transposed), x_ref/o_ref: [TB, HID]
    y = jnp.dot(ref_ref[...], wt_ref[...], preferred_element_type=jnp.float32)
    # Elementwise multiply on the VPU, tanh on the EUP, f32 internally.
    o_ref[...] = jnp.tanh(y * x_ref[...].astype(jnp.float32)).astype(o_ref.dtype)


def _round_up(n, m):
    return ((n + m - 1) // m) * m


def multiply_c(x, ref, weight, *, block_b=4096):
    """x: [B, HID], ref: [B, IN], weight: [HID, IN] (PyTorch Linear layout)."""
    B, HID = x.shape
    B2, IN = ref.shape
    assert B == B2 and weight.shape == (HID, IN)

    # One-time wrapper-side relayout of the tiny weight to MXU-native [IN, HID].
    w_t = jnp.transpose(weight).astype(weight.dtype)

    # Sublane multiple: 8 rows for 4-byte dtypes, 16 for 2-byte (bf16) packing.
    itemsize = jnp.dtype(x.dtype).itemsize
    sub = 16 if itemsize == 2 else 8

    # Cap the double-buffered VMEM footprint (~2 * tb * (IN + 2*HID) * itemsize)
    # at ~12 MiB so we stay under v5e's 16 MiB scoped-VMEM default without
    # having to raise vmem_limit_bytes on any generation.
    vmem_budget = 12 * 1024 * 1024
    row_bytes = (IN + 2 * HID) * itemsize
    max_tb_vmem = max(sub, ((vmem_budget // (2 * row_bytes)) // sub) * sub)

    if B <= 2 * sub:
        # Tiny batch: single full-array tile (block shape == array shape is legal).
        tb = B
    else:
        # Keep >= 2 grid steps for megacore, but never exceed block_b / VMEM cap.
        tb = min(block_b, _round_up(pl.cdiv(B, 2), sub))
        tb = min(tb, max_tb_vmem)

    grid = (pl.cdiv(B, tb),)

    # Advisory cost hint so XLA schedules this custom call sensibly when fused
    # into a larger jit.
    cost = pl.CostEstimate(
        flops=2 * B * IN * HID,
        transcendentals=B * HID,
        bytes_accessed=itemsize * (B * IN + HID * IN + 2 * B * HID),
    )

    return pl.pallas_call(
        multiply_c_kernel,
        out_shape=jax.ShapeDtypeStruct((B, HID), x.dtype),
        grid_spec=pl.GridSpec(
            grid=grid,
            in_specs=[
                # ref: tiled over the batch axis.
                pl.BlockSpec((tb, IN), lambda i: (i, 0)),
                # weight [IN, HID]: same block every step -> stays VMEM-resident.
                pl.BlockSpec((IN, HID), lambda i: (0, 0)),
                # x: tiled over the batch axis.
                pl.BlockSpec((tb, HID), lambda i: (i, 0)),
            ],
            # Output keeps the full HID lane dim (multiple of 128 -> unmasked vst).
            out_specs=pl.BlockSpec((tb, HID), lambda i: (i, 0)),
        ),
        compiler_params=pltpu.CompilerParams(
            # Batch tiles are independent -> "parallel" (megacore sharding on v7x).
            dimension_semantics=("parallel",),
        ),
        cost_estimate=cost,
    )(ref, w_t, x)


if __name__ == "__main__":
    # Small shapes consistent with the module: Linear(in_size -> hidden), no bias.
    B, IN, HID = 8, 32, 128

    key = jax.random.PRNGKey(0)
    kx, kr, kw = jax.random.split(key, 3)

    x = jax.random.normal(kx, (B, HID), dtype=jnp.float32)
    ref = jax.random.normal(kr, (B, IN), dtype=jnp.float32)
    # Deterministic synthetic weight, PyTorch Linear layout [hidden, in_size].
    weight = jax.random.normal(kw, (HID, IN), dtype=jnp.float32) * (1.0 / IN ** 0.5)

    out = multiply_c(x, ref, weight)
    jax.block_until_ready(out)

    expected = jnp.tanh((ref @ weight.T) * x)
    assert out.shape == (B, HID)
    assert jnp.allclose(out, expected, atol=1e-5, rtol=1e-5)

    # Multi-tile path: B=2048 -> two balanced 1024-row parallel grid steps.
    Bb = 2048
    kx2, kr2 = jax.random.split(kx)
    xb = jax.random.normal(kx2, (Bb, HID), dtype=jnp.float32)
    refb = jax.random.normal(kr2, (Bb, IN), dtype=jnp.float32)
    outb = multiply_c(xb, refb, weight)
    jax.block_until_ready(outb)
    expectedb = jnp.tanh((refb @ weight.T) * xb)
    assert jnp.allclose(outb, expectedb, atol=1e-5, rtol=1e-5)

    # bf16 streaming path (halves HBM traffic; accumulate + tanh stay f32).
    xh = xb.astype(jnp.bfloat16)
    refh = refb.astype(jnp.bfloat16)
    wh = weight.astype(jnp.bfloat16)
    outh = multiply_c(xh, refh, wh)
    jax.block_until_ready(outh)
    expectedh = jnp.tanh((refh.astype(jnp.float32) @ wh.astype(jnp.float32).T)
                         * xh.astype(jnp.float32))
    assert jnp.allclose(outh.astype(jnp.float32), expectedh, atol=3e-2, rtol=3e-2)

    print("KERNEL_OK")
</pallas_src>

<mosaic_0001>
module attributes {stable_mosaic.version = 11 : i64} {
  func.func @multiply_c_kernel(%arg0: i32, %arg1: memref<8x32xf32, #tpu.memory_space<vmem>>, %arg2: memref<32x128xf32, #tpu.memory_space<vmem>>, %arg3: memref<8x128xf32, #tpu.memory_space<vmem>>, %arg4: memref<8x128xf32, #tpu.memory_space<vmem>>) attributes {dimension_semantics = [#tpu.dimension_semantics<parallel>], iteration_bounds = array<i64: 1>, scalar_prefetch = 0 : i64, scratch_operands = 0 : i64, tpu.core_type = #tpu.core_type<tc>, window_params = [{transform_indices = @transform_0, window_bounds = array<i64: 8, 32>}, {pipeline_mode = #tpu.pipeline_mode<synchronous>, transform_indices = @transform_1, window_bounds = array<i64: 32, 128>}, {transform_indices = @transform_2, window_bounds = array<i64: 8, 128>}, {transform_indices = @transform_3, window_bounds = array<i64: 8, 128>}]} {
    %c0 = arith.constant 0 : index
    %c0_0 = arith.constant 0 : index
    %0 = vector.load %arg1[%c0, %c0_0] : memref<8x32xf32, #tpu.memory_space<vmem>>, vector<8x32xf32>
    %c0_1 = arith.constant 0 : index
    %c0_2 = arith.constant 0 : index
    %1 = vector.load %arg2[%c0_1, %c0_2] : memref<32x128xf32, #tpu.memory_space<vmem>>, vector<32x128xf32>
    %cst = arith.constant dense<0.000000e+00> : vector<8x128xf32>
    %2 = tpu.matmul %0, %1, %cst {dimension_numbers = #tpu.dot_dimension_numbers<[1], [0], [0], [1], [0, 0, 1, 1], [], []>} : vector<8x32xf32>, vector<32x128xf32>, vector<8x128xf32> -> vector<8x128xf32>
    %c0_3 = arith.constant 0 : index
    %c0_4 = arith.constant 0 : index
    %3 = vector.load %arg3[%c0_3, %c0_4] : memref<8x128xf32, #tpu.memory_space<vmem>>, vector<8x128xf32>
    %4 = arith.mulf %2, %3 : vector<8x128xf32>
    %5 = math.tanh %4 : vector<8x128xf32>
    %c0_5 = arith.constant 0 : index
    %c0_6 = arith.constant 0 : index
    %6 = vector.load %arg4[%c0_5, %c0_6] : memref<8x128xf32, #tpu.memory_space<vmem>>, vector<8x128xf32>
    tpu.vector_store %arg4[%c0_5, %c0_6], %5 {strides = array<i32>} : memref<8x128xf32, #tpu.memory_space<vmem>>, vector<8x128xf32>,
    return
  }
  func.func @transform_0(%arg0: i32) -> (i32, i32) {
    %c0_i32 = arith.constant 0 : i32
    %c0_i32_0 = arith.constant 0 : i32
    return %arg0, %c0_i32 : i32, i32
  }
  func.func @transform_1(%arg0: i32) -> (i32, i32) {
    %c0_i32 = arith.constant 0 : i32
    %c0_i32_0 = arith.constant 0 : i32
    %c0_i32_1 = arith.constant 0 : i32
    return %c0_i32, %c0_i32_0 : i32, i32
  }
  func.func @transform_2(%arg0: i32) -> (i32, i32) {
    %c0_i32 = arith.constant 0 : i32
    %c0_i32_0 = arith.constant 0 : i32
    return %arg0, %c0_i32 : i32, i32
  }
  func.func @transform_3(%arg0: i32) -> (i32, i32) {
    %c0_i32 = arith.constant 0 : i32
    %c0_i32_0 = arith.constant 0 : i32
    return %arg0, %c0_i32 : i32, i32
  }
}

</mosaic_0001>

<bundles_post_ra>
// kernel: tpu_custom_call.1
= control target key start
LH: loop header
LB: loop body
LE: loop exit
PB: predicated region body
PF: predicated region fallthrough
CT: control target
= control target key end

     0   :  { %8 = vsyncpa [#allocation3], 0  ;;  %s258_s0 = inlined_call_operand.hbm [shape: f32[8,32], index: 0, kind: input, shape index: {}]   ;;  %s259_s1 = inlined_call_operand.hbm [shape: f32[32,128], index: 1, kind: input, shape index: {}]   ;;  %s260_s2 = inlined_call_operand.hbm [shape: f32[8,128], index: 2, kind: input, shape index: {}]   ;;  %s261_s3 = inlined_call_operand.hbm [shape: f32[8,128], index: 3, kind: output, shape index: {}]  }
   0x1   :  { %9 = vsyncpa [#allocation6], 0  ;;  %s26_s14 = sshll.u32 %s259_s1, 4  ;;  %s27_s14 = int_to_ptr.hbm [resolvable:$true] %s26_s14 }
   0x2   :  { %10 = vsyncpa [#allocation4], 0  ;;  %s220_s15 = smov [#allocation5]   ;;  %s16_s19 = sshll.u32 %s258_s0, 4  ;;  %s17_s19 = int_to_ptr.hbm [resolvable:$true] %s16_s19 }
   0x3   :  { %s28_s16 = sshll.u32 %s220_s15, 4  ;;  %s221_s20 = smov 128   ;;  %s29_s16 = int_to_ptr.vmem [resolvable:$true] %s28_s16 }
   0x4   :  { %s222_s21 = smov 8   ;;  %s223_s22 = smov [#allocation2]  }
   0x5   :  { %34 = dma.hbm_to_vmem [thread:$0]  %s27_s14, 512, %s29_s16, [#allocation6], %s221_s20, %s221_s20, %s222_s21  }
   0x6   :  { %s18_s23 = sshll.u32 %s223_s22, 4  ;;  %s40_s26 = sshll.u32 %s260_s2, 4  ;;  %s19_s23 = int_to_ptr.vmem [resolvable:$true] %s18_s23  ;;  %s41_s26 = int_to_ptr.hbm [resolvable:$true] %s40_s26 }
   0x7   :  { %21 = dma.hbm_to_vmem [thread:$0]  %s17_s19, 128, %s19_s23, [#allocation3]  }
   0x8   :  { %s224_s1 = smov [#allocation7]  }
   0x9   :  { %s42_s27 = sshll.u32 %s224_s1, 4  ;;  %s43_s27 = int_to_ptr.vmem [resolvable:$true] %s42_s27 }
   0xa   :  { %45 = dma.hbm_to_vmem [thread:$0]  %s41_s26, 128, %s43_s27, [#allocation6]  }
   0xb   :  { %214 = dma.done.wait [#allocation3], 128  }
   0xc   :  { %215 = vsyncadd [#allocation3], 4294967168 }
   0xd   :  { %216 = dma.done.wait [#allocation6], 640  }
   0xe   :  { %217 = vsyncadd [#allocation6], 4294966656  ;;  %v62_v0 = vld [vmem:[#allocation5 + $0x18] sm:$0xff]  ;;  %v61_v1 = vld [vmem:[#allocation5 + $0x10] sm:$0xff]  ;;  %vm63_vm0 = vcmask 261120   ;;  %s225_s0 = smov [#allocation8]  }
   0xf   :  { %79 = vmatpush.msra.mxu0 %v62_v0  ;;  %v60_v2 = vld [vmem:[#allocation5 + $0x8] sm:$0xff]  ;;  %v59_v3 = vld [vmem:[#allocation5] sm:$0xff]  ;;  %v58_v4 = vld [vmem:[#allocation2] sm:$0xff]  ;;  %s96_s2 = sshll.u32 %s225_s0, 4  ;;  %s98_s30 = sshll.u32 %s261_s3, 4  ;;  %s97_s2 = int_to_ptr.vmem [resolvable:$true] %s96_s2  ;;  %s99_s30 = int_to_ptr.hbm [resolvable:$true] %s98_s30 }
  0x10   :  { %v87_v5 = vld [vmem:[#allocation7] sm:$0xff] }
  0x11   :  { %80 = vmatpush.msra.mxu0 %v61_v1 }
  0x13   :  { %81 = vmatpush.msra.mxu0 %v60_v2 }
  0x15   :  { %82 = vmatpush.msra.mxu0 %v59_v3 }
  0x16   :  { %109 = vmatmul.msk.f32.vlgmr.msra.gmra.mxu0 %vm63_vm0, %v58_v4 }
  0x93   :  { %v84_v6 = vpop.f32.mrf.mxu0 }
  0x94   :  { %v88_v7 = vmul.f32 %v87_v5, %v84_v6 }
  0x96   :  { %116 = vtanh.f32 %v88_v7 }
  0x9c   :  { %v117_v8 = vpop.eup %116 }
  0x9d   :  { %90 = vst [vmem:[#allocation8] sm:$0xff] %v117_v8 }
  0x9e   :  { %101 = dma.vmem_to_hbm [thread:$0]  %s97_s2, 128, %s99_s30, [#allocation4]  }
  0x9f   :  { %218 = dma.done.wait [#allocation4], 128  }
  0xa0   :  { %219 = vsyncadd [#allocation4], 4294967168 }
  0xa1   :  { %106 = vsyncpa [#allocation3], 1 }
  0xa2   :  { %107 = vsyncpa [#allocation6], 1 }
  0xa3   :  { %108 = vsyncpa [#allocation4], 1 }

</bundles_post_ra>
